<compile_context>
chip_gen: v7x
topology: tpu7x:2x2x1
jax: 0.10.0
libtpu: 0.0.40
codegen_flags: <defaults>
</compile_context>

<pallas_src>
import jax
import jax.numpy as jnp
from jax.experimental import pallas as pl
from jax.experimental.pallas import tpu as pltpu


def _round_up(x, m):
    return ((x + m - 1) // m) * m


def _scale_kernel(x_ref, g_ref, o_ref):
    # x_ref: (row_tile, hw_tile)  input dtype
    # g_ref: (row_tile, 1)        f32 per-row gate (one gate per (n, c) row)
    # o_ref: (row_tile, hw_tile)  output dtype == input dtype
    x = x_ref[...].astype(jnp.float32)
    o_ref[...] = (x * g_ref[...]).astype(o_ref.dtype)


def self_attention_pallas(x_nchw, w1, b1, w2, b2, *, nonlinear="relu",
                          negative_slope=0.2, hw_tile_max=2048, row_tile_max=64):
    """SE-style self attention.

    x_nchw: (N, C, H, W); w1: (C, C//k), b1: (C//k,), w2: (C//k, C), b2: (C,)
    (weights stored transposed vs. torch nn.Linear so the math is y = x @ W).
    """
    N, C, H, W = x_nchw.shape
    HW = H * W
    out_dtype = x_nchw.dtype

    # ---- squeeze/excite gate: tiny math, hoisted to plain XLA (f32) ----------
    pooled = jnp.mean(x_nchw.astype(jnp.float32), axis=(2, 3))            # (N, C)
    h = pooled @ w1.astype(jnp.float32) + b1.astype(jnp.float32)          # (N, C//k)
    if nonlinear == "relu":
        h = jnp.maximum(h, 0.0)
    elif nonlinear == "leakyrelu":
        h = jnp.where(h >= 0.0, h, negative_slope * h)
    else:
        # TODO(synk): PReLU branch (learnable slope parameter) not implemented.
        raise ValueError(f"unsupported nonlinear: {nonlinear}")
    gate = jax.nn.sigmoid(h @ w2.astype(jnp.float32) + b2.astype(jnp.float32))  # (N, C)

    # ---- Pallas: lane-dense per-row scale over the (N*C, HW) view ------------
    R = N * C
    x2 = x_nchw.reshape(R, HW)
    g2 = gate.reshape(R, 1).astype(jnp.float32)

    hw_tile = min(_round_up(HW, 128), hw_tile_max)    # multiple of 128 lanes
    HWp = _round_up(HW, hw_tile)
    row_tile = min(_round_up(R, 8), row_tile_max)     # multiple of 8 sublanes
    Rp = _round_up(R, row_tile)

    if HWp != HW or Rp != R:                          # e.g. 7x7 maps -> pad to 128
        x2 = jnp.pad(x2, ((0, Rp - R), (0, HWp - HW)))
        g2 = jnp.pad(g2, ((0, Rp - R), (0, 0)))

    grid = (Rp // row_tile, HWp // hw_tile)

    out = pl.pallas_call(
        _scale_kernel,
        out_shape=jax.ShapeDtypeStruct((Rp, HWp), out_dtype),
        grid_spec=pltpu.PrefetchScalarGridSpec(
            num_scalar_prefetch=0,
            grid=grid,
            in_specs=[
                pl.BlockSpec((row_tile, hw_tile), lambda i, j: (i, j)),
                pl.BlockSpec((row_tile, 1), lambda i, j: (i, 0)),
            ],
            out_specs=pl.BlockSpec((row_tile, hw_tile), lambda i, j: (i, j)),
        ),
        compiler_params=pltpu.CompilerParams(
            dimension_semantics=("parallel", "parallel"),
            vmem_limit_bytes=32 * 1024 * 1024,
        ),
        input_output_aliases={0: 0},   # x view is consumed; reuse its HBM buffer
    )(x2, g2)

    if HWp != HW or Rp != R:
        out = out[:R, :HW]
    return out.reshape(N, C, H, W)


def reference_jax(x_nchw, w1, b1, w2, b2):
    pooled = jnp.mean(x_nchw, axis=(2, 3))                     # (N, C)
    h = jnp.maximum(pooled @ w1 + b1, 0.0)                     # (N, C//k)
    gate = jax.nn.sigmoid(h @ w2 + b2)                         # (N, C)
    return x_nchw * gate[:, :, None, None]


if __name__ == "__main__":
    # Module config: channels=4, k=2, nonlinear='relu'
    N, C, H, W = 2, 4, 16, 16
    k = 2
    Ck = C // k

    key = jax.random.PRNGKey(0)
    kx, k1, k2, k3, k4 = jax.random.split(key, 5)

    x = jax.random.normal(kx, (N, C, H, W), dtype=jnp.float32)

    # PyTorch nn.Linear weight is (out, in); we store the transposed (in, out)
    # form so the math is x @ W.
    w1 = jax.random.normal(k1, (C, Ck), dtype=jnp.float32) * 0.5   # linear1.weight.T
    b1 = jax.random.normal(k2, (Ck,), dtype=jnp.float32) * 0.1     # linear1.bias
    w2 = jax.random.normal(k3, (Ck, C), dtype=jnp.float32) * 0.5   # linear2.weight.T
    b2 = jax.random.normal(k4, (C,), dtype=jnp.float32) * 0.1      # linear2.bias

    ref = reference_jax(x, w1, b1, w2, b2)

    out = jax.jit(self_attention_pallas)(x, w1, b1, w2, b2)
    out = jax.block_until_ready(out)

    assert out.shape == (N, C, H, W)
    assert out.dtype == x.dtype
    assert jnp.allclose(out, ref, atol=1e-5, rtol=1e-5), "mismatch vs reference"

    print("KERNEL_OK")
</pallas_src>

<mosaic_0001>
module attributes {stable_mosaic.version = 11 : i64} {
  func.func @_scale_kernel(%arg0: i32, %arg1: i32, %arg2: memref<8x256xf32, #tpu.memory_space<vmem>>, %arg3: memref<8x1xf32, #tpu.memory_space<vmem>>, %arg4: memref<8x256xf32, #tpu.memory_space<vmem>>) attributes {dimension_semantics = [#tpu.dimension_semantics<parallel>, #tpu.dimension_semantics<parallel>], iteration_bounds = array<i64: 1, 1>, scalar_prefetch = 0 : i64, scratch_operands = 0 : i64, tpu.core_type = #tpu.core_type<tc>, window_params = [{transform_indices = @transform_0, window_bounds = array<i64: 8, 256>}, {transform_indices = @transform_1, window_bounds = array<i64: 8, 1>}, {transform_indices = @transform_2, window_bounds = array<i64: 8, 256>}]} {
    %c0 = arith.constant 0 : index
    %c0_0 = arith.constant 0 : index
    %0 = vector.load %arg2[%c0, %c0_0] : memref<8x256xf32, #tpu.memory_space<vmem>>, vector<8x256xf32>
    %c0_1 = arith.constant 0 : index
    %c0_2 = arith.constant 0 : index
    %1 = vector.load %arg3[%c0_1, %c0_2] : memref<8x1xf32, #tpu.memory_space<vmem>>, vector<8x1xf32>
    %2 = vector.broadcast %1 : vector<8x1xf32> to vector<8x256xf32>
    %3 = arith.mulf %0, %2 : vector<8x256xf32>
    %c0_3 = arith.constant 0 : index
    %c0_4 = arith.constant 0 : index
    %4 = vector.load %arg4[%c0_3, %c0_4] : memref<8x256xf32, #tpu.memory_space<vmem>>, vector<8x256xf32>
    tpu.vector_store %arg4[%c0_3, %c0_4], %3 {strides = array<i32>} : memref<8x256xf32, #tpu.memory_space<vmem>>, vector<8x256xf32>,
    return
  }
  func.func @transform_0(%arg0: i32, %arg1: i32) -> (i32, i32) {
    %c0_i32 = arith.constant 0 : i32
    return %arg0, %arg1 : i32, i32
  }
  func.func @transform_1(%arg0: i32, %arg1: i32) -> (i32, i32) {
    %c0_i32 = arith.constant 0 : i32
    %c0_i32_0 = arith.constant 0 : i32
    return %arg0, %c0_i32 : i32, i32
  }
  func.func @transform_2(%arg0: i32, %arg1: i32) -> (i32, i32) {
    %c0_i32 = arith.constant 0 : i32
    return %arg0, %arg1 : i32, i32
  }
}

</mosaic_0001>

<bundles_post_ra>
// kernel: self_attention_pallas.1
= control target key start
LH: loop header
LB: loop body
LE: loop exit
PB: predicated region body
PF: predicated region fallthrough
CT: control target
= control target key end

     0   :  { %v29_v0 = vmov 0   ;;  %s60_s1 = inlined_call_operand.vmem [shape: f32[8,1], index: 1, kind: input, shape index: {}]   ;;  %s61_s0 = inlined_call_operand.vmem [shape: f32[8,256], index: 0, kind: input, shape index: {}, may-alias: {0,2}]   ;;  %s62_s2 = inlined_call_operand.vmem [shape: f32[8,256], index: 2, kind: output, shape index: {}, may-alias: {0,2}]  }
   0x1   :  { %28 = vset.pattern.permute.xlu0 %v29_v0  ;;  %v13_v1 = vld [vmem:[%s60_s1] sm:$0xff]  ;;  %v12_v3 = vld [vmem:[%s61_s0 + $0x8] sm:$0xff] }
   0x2   :  { %16 = vperm.xlu0 %28, %v13_v1   ;;  %v11_v2 = vld [vmem:[%s61_s0] sm:$0xff] }
  0x81   :  { %v17_v4 = vpop.permute.xlu0 %16 }
  0x82   :  { %v19_v5 = vmul.f32 %v17_v4, %v11_v2  ;;  %v20_v6 = vmul.f32 %v17_v4, %v12_v3 }
  0x84   :  { %21 = vst [vmem:[%s62_s2] sm:$0xff] %v19_v5  ;;  %22 = vst [vmem:[%s62_s2 + $0x8] sm:$0xff] %v20_v6 }

</bundles_post_ra>
